<compile_context>
chip_gen: v7x
topology: tpu7x:2x2x1
jax: 0.10.0
libtpu: 0.0.40
codegen_flags: <defaults>
</compile_context>

<pallas_src>
import functools

import jax
import jax.numpy as jnp
from jax.experimental import pallas as pl
from jax.experimental.pallas import tpu as pltpu


def _min_value(dtype):
    dtype = jnp.dtype(dtype)
    if jnp.issubdtype(dtype, jnp.floating):
        return jnp.array(-jnp.inf, dtype=dtype)
    if jnp.issubdtype(dtype, jnp.integer):
        return jnp.array(jnp.iinfo(dtype).min, dtype=dtype)
    if dtype == jnp.bool_:
        return jnp.array(False, dtype=dtype)
    raise NotImplementedError(f"unsupported dtype for max-reduce: {dtype}")


def _max_reduce_kernel(x_ref, o_ref, *, s_total, s_blk):
    # x_ref: (s_blk, tm, N) chunk of the input
    # o_ref: (tm, N) accumulator, resident across the reduction (last) grid axis
    k = pl.program_id(1)  # S-chunk index (reduction axis, last in grid)

    x = x_ref[...]
    if s_total % s_blk != 0:
        # Mask padded rows of the (possibly partial) last chunk.
        row = jax.lax.broadcasted_iota(jnp.int32, x.shape, 0)
        valid = (k * s_blk + row) < s_total
        x = jnp.where(valid, x, _min_value(x.dtype))

    partial_max = jnp.max(x, axis=0)  # (tm, N)

    @pl.when(k == 0)
    def _():
        o_ref[...] = partial_max

    @pl.when(k != 0)
    def _():
        o_ref[...] = jnp.maximum(o_ref[...], partial_max)


def _choose_blocks(S, M, N, itemsize):
    # Target ~4 MiB per input block; double-buffered input (~8 MiB) plus the
    # resident (tm, N) accumulator stays well under the default scoped-VMEM
    # limit on every generation (v5e 16 MiB, v6e/v7x 32 MiB).
    budget_elems = (4 * 1024 * 1024) // max(1, itemsize)
    # tm: full M when modest; otherwise a 512-row tile (multiple of 8/16/32,
    # so the (sublane, lane) block constraint holds for all TPU dtypes).
    tm = M if M <= 1024 else 512
    s_blk = max(1, min(S, budget_elems // max(1, tm * N)))
    return s_blk, tm


def _max_over_dim0_3d(x, s_blk=None, tm=None):
    """Max over axis 0 of a 3-D array (S, M, N) via a Pallas kernel."""
    S, M, N = x.shape
    auto_s, auto_m = _choose_blocks(S, M, N, jnp.dtype(x.dtype).itemsize)
    s_blk = auto_s if s_blk is None else min(s_blk, S)
    tm = auto_m if tm is None else min(tm, M)

    grid = (pl.cdiv(M, tm), pl.cdiv(S, s_blk))

    kernel = functools.partial(_max_reduce_kernel, s_total=S, s_blk=s_blk)

    return pl.pallas_call(
        kernel,
        out_shape=jax.ShapeDtypeStruct((M, N), x.dtype),
        grid_spec=pltpu.PrefetchScalarGridSpec(
            num_scalar_prefetch=0,
            grid=grid,
            in_specs=[
                pl.BlockSpec((s_blk, tm, N), lambda m, s: (s, m, 0)),
            ],
            out_specs=pl.BlockSpec((tm, N), lambda m, s: (m, 0)),
        ),
        compiler_params=pltpu.CompilerParams(
            # M-tiles are independent (parallel, megacore-shardable);
            # the S-chunk axis revisits the output block (arbitrary, last).
            dimension_semantics=("parallel", "arbitrary"),
        ),
    )(x)


def attention_forward(vec: jax.Array, s_blk=None, tm=None) -> jax.Array:
    """Equivalent of torch.max(vec, dim=0)[0] for an input of rank >= 1."""
    if vec.ndim == 1:
        # (S,) -> scalar max; route through the same kernel via a (S,1,1) view.
        return _max_over_dim0_3d(vec[:, None, None], s_blk=s_blk, tm=tm)[0, 0]

    S = vec.shape[0]
    rest = vec.shape[1:]
    N = rest[-1]
    M = 1
    for d in rest[:-1]:
        M *= d
    x = vec.reshape(S, M, N)
    out = _max_over_dim0_3d(x, s_blk=s_blk, tm=tm)
    return out.reshape(rest)


if __name__ == "__main__":
    key = jax.random.PRNGKey(0)

    # Primary check: small shapes matching the module's forward (reduce dim 0).
    S, M, N = 8, 16, 128
    vec = jax.random.normal(key, (S, M, N), dtype=jnp.float32)

    out = attention_forward(vec)
    out = jax.block_until_ready(out)

    ref = jnp.max(vec, axis=0)
    assert out.shape == ref.shape == (M, N)
    assert jnp.allclose(out, ref), "mismatch vs reference max-reduction"

    # Secondary check: force multi-chunk reduction (with a partial last chunk)
    # and M-tiling to exercise the accumulator / masking paths.
    key2 = jax.random.PRNGKey(0)
    vec2 = jax.random.normal(key2, (10, 16, 128), dtype=jnp.float32)
    out2 = jax.block_until_ready(attention_forward(vec2, s_blk=3, tm=8))
    ref2 = jnp.max(vec2, axis=0)
    assert jnp.allclose(out2, ref2), "mismatch in chunked/tiled path"

    print("KERNEL_OK")
</pallas_src>

<mosaic_0001>
module attributes {stable_mosaic.version = 11 : i64} {
  func.func @_max_reduce_kernel(%arg0: i32, %arg1: i32, %arg2: memref<8x16x128xf32, #tpu.memory_space<vmem>>, %arg3: memref<16x128xf32, #tpu.memory_space<vmem>>) attributes {dimension_semantics = [#tpu.dimension_semantics<parallel>, #tpu.dimension_semantics<arbitrary>], iteration_bounds = array<i64: 1, 1>, scalar_prefetch = 0 : i64, scratch_operands = 0 : i64, tpu.core_type = #tpu.core_type<tc>, window_params = [{transform_indices = @transform_0, window_bounds = array<i64: 8, 16, 128>}, {transform_indices = @transform_1, window_bounds = array<i64: 16, 128>}]} {
    %c0 = arith.constant 0 : index
    %c0_0 = arith.constant 0 : index
    %c0_1 = arith.constant 0 : index
    %0 = vector.load %arg2[%c0, %c0_0, %c0_1] : memref<8x16x128xf32, #tpu.memory_space<vmem>>, vector<8x16x128xf32>
    %cst = arith.constant dense<0xFF800000> : vector<16x128xf32>
    %1 = vector.multi_reduction <maximumf>, %0, %cst [0] : vector<8x16x128xf32> to vector<16x128xf32>
    %c0_i32 = arith.constant 0 : i32
    %2 = arith.cmpi eq, %arg1, %c0_i32 : i32
    %3 = arith.extui %2 : i1 to i32
    %c0_i32_2 = arith.constant 0 : i32
    %4 = arith.cmpi ne, %3, %c0_i32_2 : i32
    scf.if %4 {
      %c0_5 = arith.constant 0 : index
      %c0_6 = arith.constant 0 : index
      %8 = vector.load %arg3[%c0_5, %c0_6] : memref<16x128xf32, #tpu.memory_space<vmem>>, vector<16x128xf32>
      tpu.vector_store %arg3[%c0_5, %c0_6], %1 {strides = array<i32>} : memref<16x128xf32, #tpu.memory_space<vmem>>, vector<16x128xf32>,
    } else {
    }
    %c0_i32_3 = arith.constant 0 : i32
    %5 = arith.cmpi ne, %arg1, %c0_i32_3 : i32
    %6 = arith.extui %5 : i1 to i32
    %c0_i32_4 = arith.constant 0 : i32
    %7 = arith.cmpi ne, %6, %c0_i32_4 : i32
    scf.if %7 {
      %c0_5 = arith.constant 0 : index
      %c0_6 = arith.constant 0 : index
      %8 = vector.load %arg3[%c0_5, %c0_6] : memref<16x128xf32, #tpu.memory_space<vmem>>, vector<16x128xf32>
      %9 = arith.maximumf %8, %1 : vector<16x128xf32>
      %c0_7 = arith.constant 0 : index
      %c0_8 = arith.constant 0 : index
      %10 = vector.load %arg3[%c0_7, %c0_8] : memref<16x128xf32, #tpu.memory_space<vmem>>, vector<16x128xf32>
      tpu.vector_store %arg3[%c0_7, %c0_8], %9 {strides = array<i32>} : memref<16x128xf32, #tpu.memory_space<vmem>>, vector<16x128xf32>,
    } else {
    }
    return
  }
  func.func @transform_0(%arg0: i32, %arg1: i32) -> (i32, i32, i32) {
    %c0_i32 = arith.constant 0 : i32
    %c0_i32_0 = arith.constant 0 : i32
    return %arg1, %arg0, %c0_i32 : i32, i32, i32
  }
  func.func @transform_1(%arg0: i32, %arg1: i32) -> (i32, i32) {
    %c0_i32 = arith.constant 0 : i32
    %c0_i32_0 = arith.constant 0 : i32
    return %arg0, %c0_i32 : i32, i32
  }
}

</mosaic_0001>

<bundles_post_ra>
// kernel: tpu_custom_call.1
= control target key start
LH: loop header
LB: loop body
LE: loop exit
PB: predicated region body
PF: predicated region fallthrough
CT: control target
= control target key end

     0   :  { %6 = vsyncpa [#allocation3], 0  ;;  %s182_s0 = inlined_call_operand.hbm [shape: f32[8,16,128], index: 0, kind: input, shape index: {}]   ;;  %s183_s1 = inlined_call_operand.hbm [shape: f32[16,128], index: 1, kind: output, shape index: {}]  }
   0x1   :  { %7 = vsyncpa [#allocation4], 0  ;;  %s138_s6 = smov [#allocation2]   ;;  %s90_s10 = scalar_lea.hbm %s182_s0, 2048 }
   0x2   :  { %s13_s7 = sshll.u32 %s138_s6, 4  ;;  %p91_p0 = scmp.ne.s32.totalorder %s182_s0, %s90_s10  ;;  %s14_s7 = int_to_ptr.vmem [resolvable:$true] %s13_s7 }
   0x3   :  { %p94_p1 = scmp.lt.u32.totalorder %s90_s10, %s182_s0 }
   0x5   :  { %p96_p2 = pnand %p94_p1, %p91_p0 }
   0x7   :  { %99 = shalt.err (!%p96_p2)
}
   0x8   :  { %s100_s15 = scalar_lea.vmem %s14_s7, 2048  ;;  %p105_p4 = scmp.lt.s32.totalorder %s14_s7, %s14_s7 }
   0x9   :  { %p101_p3 = scmp.ne.s32.totalorder %s14_s7, %s100_s15  ;;  %p106_p5 = scmp.lt.s32.totalorder %s100_s15, %s100_s15 }
   0xb   :  { %p107_p6 = por %p106_p5, %p105_p4 }
   0xd   :  { %p108_p7 = pnand %p107_p6, %p101_p3 }
   0xf   :  { %111 = shalt.err (!%p108_p7)
}
  0x10   :  { %s139_s16 = smov 128   ;;  %s140_s17 = smov 8  }
  0x11   :  { %19 = dma.hbm_to_vmem [thread:$0]  %s182_s0, 2048, %s14_s7, [#allocation3], %s139_s16, %s139_s16, %s140_s17  }
  0x12   :  { %134 = dma.done.wait [#allocation3], 2048  }
  0x13   :  { %135 = vsyncadd [#allocation3], 4294965248  ;;  %v23_v0 = vld [vmem:[#allocation2] sm:$0xff]  ;;  %v25_v1 = vld [vmem:[#allocation2 + $0x10] sm:$0xff]  ;;  %s141_s0 = smov [#allocation5]  }
  0x14   :  { %v27_v2 = vld [vmem:[#allocation2 + $0x20] sm:$0xff]  ;;  %v29_v3 = vld [vmem:[#allocation2 + $0x30] sm:$0xff]  ;;  %v24_v10 = vld [vmem:[#allocation2 + $0x8] sm:$0xff]  ;;  %s74_s20 = sshll.u32 %s141_s0, 4  ;;  %s75_s20 = int_to_ptr.vmem [resolvable:$true] %s74_s20 }
  0x15   :  { %v31_v4 = vld [vmem:[#allocation2 + $0x40] sm:$0xff]  ;;  %v33_v5 = vld [vmem:[#allocation2 + $0x50] sm:$0xff]  ;;  %v39_v6 = vmax.f32 %v23_v0, %v27_v2  ;;  %v40_v9 = vmax.f32 %v25_v1, %v29_v3  ;;  %v26_v12 = vld [vmem:[#allocation2 + $0x18] sm:$0xff]  ;;  %s112_s21 = scalar_lea.vmem %s75_s20, 256  ;;  %p117_p9 = scmp.lt.s32.totalorder %s75_s20, %s75_s20 }
  0x16   :  { %v35_v7 = vld [vmem:[#allocation2 + $0x60] sm:$0xff]  ;;  %v37_v8 = vld [vmem:[#allocation2 + $0x70] sm:$0xff]  ;;  %v28_v13 = vld [vmem:[#allocation2 + $0x28] sm:$0xff]  ;;  %p113_p8 = scmp.ne.s32.totalorder %s75_s20, %s112_s21  ;;  %p118_p10 = scmp.lt.s32.totalorder %s112_s21, %s112_s21 }
  0x17   :  { %v41_v11 = vmax.f32 %v39_v6, %v31_v4  ;;  %v30_v14 = vld [vmem:[#allocation2 + $0x38] sm:$0xff]  ;;  %v42_v15 = vmax.f32 %v40_v9, %v33_v5  ;;  %v32_v16 = vld [vmem:[#allocation2 + $0x48] sm:$0xff]  ;;  %v46_v18 = vmax.f32 %v24_v10, %v28_v13 }
  0x18   :  { %v34_v17 = vld [vmem:[#allocation2 + $0x58] sm:$0xff]  ;;  %v47_v19 = vmax.f32 %v26_v12, %v30_v14  ;;  %v36_v21 = vld [vmem:[#allocation2 + $0x68] sm:$0xff]  ;;  %p119_p11 = por %p118_p10, %p117_p9 }
  0x19   :  { %v43_v20 = vmax.f32 %v41_v11, %v35_v7  ;;  %v38_v22 = vld [vmem:[#allocation2 + $0x78] sm:$0xff]  ;;  %v44_v23 = vmax.f32 %v42_v15, %v37_v8  ;;  %v48_v24 = vmax.f32 %v46_v18, %v32_v16 }
  0x1a   :  { %v49_v25 = vmax.f32 %v47_v19, %v34_v17  ;;  %p120_p12 = pnand %p119_p11, %p113_p8 }
  0x1b   :  { %v45_v26 = vmax.f32 %v43_v20, %v44_v23  ;;  %v50_v27 = vmax.f32 %v48_v24, %v36_v21 }
  0x1c   :  { %v51_v28 = vmax.f32 %v49_v25, %v38_v22 }
  0x1d   :  { %57 = vst [vmem:[#allocation5] sm:$0xff] %v45_v26 }
  0x1e   :  { %v52_v29 = vmax.f32 %v50_v27, %v51_v28 }
  0x20   :  { %58 = vst [vmem:[#allocation5 + $0x8] sm:$0xff] %v52_v29 }
  0x21   :  { %123 = shalt.err (!%p120_p12)
}
  0x22   :  { %s124_s24 = scalar_lea.hbm %s183_s1, 256 }
  0x23   :  { %p125_p13 = scmp.ne.s32.totalorder %s183_s1, %s124_s24  ;;  %p128_p0 = scmp.lt.u32.totalorder %s124_s24, %s183_s1 }
  0x25   :  { %p130_p1 = pnand %p128_p0, %p125_p13 }
  0x27   :  { %133 = shalt.err (!%p130_p1)
}
  0x28   :  { %80 = dma.vmem_to_hbm [thread:$0]  %s75_s20, 256, %s183_s1, [#allocation4], %s139_s16, %s139_s16, %s140_s17  }
  0x29   :  { %136 = dma.done.wait [#allocation4], 256  }
  0x2a   :  { %137 = vsyncadd [#allocation4], 4294967040 }
  0x2b   :  { %84 = vsyncpa [#allocation3], 1 }
  0x2c   :  { %85 = vsyncpa [#allocation4], 1 }

</bundles_post_ra>
